<compile_context>
chip_gen: v6e
topology: v6e:2x2x1
jax: 0.10.0
libtpu: 0.0.40
codegen_flags: <defaults>
</compile_context>

<pallas_src>
import functools
import math

import jax
import jax.numpy as jnp
from jax.experimental import pallas as pl
from jax.experimental.pallas import tpu as pltpu

_LANES = 128
_TARGET_BLOCK_BYTES = 4 * 1024 * 1024   # ~4 MiB f32 output block per grid step
_MIN_GRID = 8                           # >= 2x TC count (v7x) + pipeline overlap


def _round_up(x: int, m: int) -> int:
    return ((x + m - 1) // m) * m


def _pos_enc_kernel(pos_ref, const_ref, out_ref, *, d, g):
    """One row-tile of the lane-folded sinusoid table.

    pos_ref:   (tile, g)     g consecutive positions packed per folded row
    const_ref: (2, g*d)      row 0: 1/denom tiled g times; row 1: phase (0 / pi/2)
    out_ref:   (tile, g*d)   lane-dense sinusoid tile
    """
    pos = pos_ref[...]                       # (tile, g) f32
    consts = const_ref[...]                  # (2, g*d) f32
    scale = consts[0:1, :]                   # (1, g*d)
    phase = consts[1:2, :]                   # (1, g*d)
    rows = pos.shape[0]

    # Expand each of the g packed positions across its d-lane channel group.
    # Kept as exact f32 VPU/XLU work (see header: an MXU dot may truncate the
    # positions to bf16 under default matmul precision).
    pieces = [jnp.broadcast_to(pos[:, j:j + 1], (rows, d)) for j in range(g)]
    pos_exp = pieces[0] if g == 1 else jnp.concatenate(pieces, axis=1)

    # cos(x) = sin(x + pi/2): one FMA + one sin (VALU polynomial) per element.
    out_ref[...] = jnp.sin(pos_exp * scale + phase).astype(out_ref.dtype)


def make_denom(d: int, T: float = 1000, offset: int = 0) -> jax.Array:
    """denom[c] = T ** (2 * ((offset + c) // 2) / d) — matches the torch __init__."""
    idx = jnp.arange(offset, offset + d, dtype=jnp.float32)
    return jnp.power(jnp.float32(T), 2.0 * jnp.floor(idx / 2.0) / d)


@functools.partial(jax.jit, static_argnames=("out_dtype",))
def positional_encoder(batch_positions: jax.Array, denom: jax.Array,
                       out_dtype=jnp.float32) -> jax.Array:
    """batch_positions: (B, T) -> (B, T, d) with d = denom.shape[0]."""
    B, S = batch_positions.shape
    (d,) = denom.shape                     # d is tied to denom; no mismatch possible
    n_rows = B * S

    # ---- lane folding: output last dim becomes a multiple of 128 lanes ------
    g = _LANES // math.gcd(d, _LANES)
    lane_w = g * d
    n_rows_pad = _round_up(n_rows, g)
    n_fold = n_rows_pad // g

    pos_flat = batch_positions.reshape(n_rows).astype(jnp.float32)
    if n_rows_pad != n_rows:               # rare ragged-fold case (tiny pad)
        pos_flat = jnp.pad(pos_flat, (0, n_rows_pad - n_rows))
    pos_fold = pos_flat.reshape(n_fold, g)

    # ---- row tiling: ~4 MiB blocks, >= _MIN_GRID steps, sublane dim % 8 == 0 -
    if n_fold <= 8:
        tile = n_fold                      # single block == full array dims (legal)
    else:
        row_cap = max(8, (_TARGET_BLOCK_BYTES // (lane_w * 4)) // 8 * 8)
        tile = min(row_cap, _round_up(pl.cdiv(n_fold, _MIN_GRID), 8))
    grid = pl.cdiv(n_fold, tile)           # ragged last block clipped by Pallas

    # ---- tiny d-sized constants, merged into one (2, lane_w) input ----------
    inv_denom = 1.0 / denom.astype(jnp.float32)
    phase = jnp.where(jnp.arange(d) % 2 == 0,
                      jnp.float32(0.0), jnp.float32(math.pi / 2.0))
    consts = jnp.stack([jnp.tile(inv_denom, g), jnp.tile(phase, g)])   # (2, lane_w)

    out = pl.pallas_call(
        functools.partial(_pos_enc_kernel, d=d, g=g),
        out_shape=jax.ShapeDtypeStruct((n_fold, lane_w), out_dtype),
        grid_spec=pltpu.PrefetchScalarGridSpec(
            num_scalar_prefetch=0,
            grid=(grid,),
            in_specs=[
                pl.BlockSpec((tile, g), lambda i: (i, 0)),
                pl.BlockSpec((2, lane_w), lambda i: (0, 0)),
            ],
            out_specs=pl.BlockSpec((tile, lane_w), lambda i: (i, 0)),
        ),
        compiler_params=pltpu.CompilerParams(
            dimension_semantics=("parallel",),
            vmem_limit_bytes=32 * 1024 * 1024,
        ),
    )(pos_fold, consts)

    # Unfold lanes back to rows; bitcasts when n_rows % g == 0 (common case).
    out = out.reshape(n_rows_pad, d)
    if n_rows_pad != n_rows:
        out = out[:n_rows]                 # only in the ragged-fold case
    return out.reshape(B, S, d)


class PositionalEncoder:
    """Mirror of the torch module: __init__(d, T, offset); __call__((B,T)) -> (B,T,d)."""

    def __init__(self, d: int, T: float = 1000, offset: int = 0):
        self.d, self.T, self.offset = d, T, offset
        self.denom = make_denom(d, T, offset)

    def __call__(self, batch_positions: jax.Array, out_dtype=jnp.float32) -> jax.Array:
        return positional_encoder(batch_positions, self.denom, out_dtype=out_dtype)


def positional_encoder_ref(batch_positions, denom):
    """Pure-JAX reference mirroring the torch forward exactly."""
    val = batch_positions[:, :, None] / denom[None, None, :]
    ch = jnp.arange(denom.shape[0])
    return jnp.where((ch % 2) == 0, jnp.sin(val), jnp.cos(val))


if __name__ == "__main__":
    d, T_const, offset = 32, 1000, 0
    enc = PositionalEncoder(d, T=T_const, offset=offset)

    key = jax.random.PRNGKey(0)
    k1, k2 = jax.random.split(key)

    # Case 1: small (B=2, T=8) -> single-block path.
    pos1 = jax.random.uniform(k1, (2, 8), jnp.float32, minval=0.0, maxval=365.0)
    out1 = jax.block_until_ready(enc(pos1))
    ref1 = positional_encoder_ref(pos1, enc.denom)
    assert out1.shape == (2, 8, d), out1.shape
    # reciprocal-mul + pi/2-phase-add vs divide+cos differ by a few ulps of the
    # (up to ~365 rad) argument; tolerance reflects that on a [-1, 1] output.
    assert jnp.allclose(out1, ref1, atol=2e-3, rtol=0.0), "case 1 mismatch"

    # Case 2: (B=2, T=50) -> multi-step grid with a ragged last block
    # (exercises Pallas boundary clipping; no wrapper pad/slice copy).
    pos2 = jax.random.uniform(k2, (2, 50), jnp.float32, minval=0.0, maxval=365.0)
    out2 = jax.block_until_ready(enc(pos2))
    ref2 = positional_encoder_ref(pos2, enc.denom)
    assert out2.shape == (2, 50, d), out2.shape
    assert jnp.allclose(out2, ref2, atol=2e-3, rtol=0.0), "case 2 mismatch"

    # Case 3: bf16 output variant (halves HBM writeback on v5e/v6e consumers).
    out3 = jax.block_until_ready(enc(pos1, out_dtype=jnp.bfloat16))
    assert out3.dtype == jnp.bfloat16
    assert jnp.allclose(out3.astype(jnp.float32), ref1, atol=1e-2, rtol=0.0), \
        "bf16 variant mismatch"

    print("KERNEL_OK")
</pallas_src>

<mosaic_0001>
module attributes {stable_mosaic.version = 11 : i64} {
  func.func @_pos_enc_kernel(%arg0: i32, %arg1: memref<4x4xf32, #tpu.memory_space<vmem>>, %arg2: memref<2x128xf32, #tpu.memory_space<vmem>>, %arg3: memref<4x128xf32, #tpu.memory_space<vmem>>) attributes {dimension_semantics = [#tpu.dimension_semantics<parallel>], iteration_bounds = array<i64: 1>, scalar_prefetch = 0 : i64, scratch_operands = 0 : i64, tpu.core_type = #tpu.core_type<tc>, window_params = [{transform_indices = @transform_0, window_bounds = array<i64: 4, 4>}, {pipeline_mode = #tpu.pipeline_mode<synchronous>, transform_indices = @transform_1, window_bounds = array<i64: 2, 128>}, {transform_indices = @transform_2, window_bounds = array<i64: 4, 128>}]} {
    %c0 = arith.constant 0 : index
    %c0_0 = arith.constant 0 : index
    %0 = vector.load %arg1[%c0, %c0_0] : memref<4x4xf32, #tpu.memory_space<vmem>>, vector<4x4xf32>
    %c0_1 = arith.constant 0 : index
    %c0_2 = arith.constant 0 : index
    %1 = vector.load %arg2[%c0_1, %c0_2] : memref<2x128xf32, #tpu.memory_space<vmem>>, vector<2x128xf32>
    %2 = vector.extract_strided_slice %1 {offsets = [0, 0], sizes = [1, 128], strides = [1, 1]} : vector<2x128xf32> to vector<1x128xf32>
    %3 = vector.extract_strided_slice %1 {offsets = [1, 0], sizes = [1, 128], strides = [1, 1]} : vector<2x128xf32> to vector<1x128xf32>
    %4 = vector.extract_strided_slice %0 {offsets = [0, 0], sizes = [4, 1], strides = [1, 1]} : vector<4x4xf32> to vector<4x1xf32>
    %5 = vector.shape_cast %4 : vector<4x1xf32> to vector<4x1xf32>
    %6 = vector.broadcast %5 : vector<4x1xf32> to vector<4x32xf32>
    %7 = vector.extract_strided_slice %0 {offsets = [0, 1], sizes = [4, 1], strides = [1, 1]} : vector<4x4xf32> to vector<4x1xf32>
    %8 = vector.shape_cast %7 : vector<4x1xf32> to vector<4x1xf32>
    %9 = vector.broadcast %8 : vector<4x1xf32> to vector<4x32xf32>
    %10 = vector.extract_strided_slice %0 {offsets = [0, 2], sizes = [4, 1], strides = [1, 1]} : vector<4x4xf32> to vector<4x1xf32>
    %11 = vector.shape_cast %10 : vector<4x1xf32> to vector<4x1xf32>
    %12 = vector.broadcast %11 : vector<4x1xf32> to vector<4x32xf32>
    %13 = vector.extract_strided_slice %0 {offsets = [0, 3], sizes = [4, 1], strides = [1, 1]} : vector<4x4xf32> to vector<4x1xf32>
    %14 = vector.shape_cast %13 : vector<4x1xf32> to vector<4x1xf32>
    %15 = vector.broadcast %14 : vector<4x1xf32> to vector<4x32xf32>
    %16 = tpu.concatenate %6, %9, %12, %15 in 1 : vector<4x32xf32>, vector<4x32xf32>, vector<4x32xf32>, vector<4x32xf32> -> vector<4x128xf32>
    %17 = vector.broadcast %2 : vector<1x128xf32> to vector<4x128xf32>
    %18 = arith.mulf %16, %17 : vector<4x128xf32>
    %19 = vector.broadcast %3 : vector<1x128xf32> to vector<4x128xf32>
    %20 = arith.addf %18, %19 : vector<4x128xf32>
    %21 = math.sin %20 : vector<4x128xf32>
    %c0_3 = arith.constant 0 : index
    %c0_4 = arith.constant 0 : index
    %22 = vector.load %arg3[%c0_3, %c0_4] : memref<4x128xf32, #tpu.memory_space<vmem>>, vector<4x128xf32>
    tpu.vector_store %arg3[%c0_3, %c0_4], %21 {strides = array<i32>} : memref<4x128xf32, #tpu.memory_space<vmem>>, vector<4x128xf32>,
    return
  }
  func.func @transform_0(%arg0: i32) -> (i32, i32) {
    %c0_i32 = arith.constant 0 : i32
    %c0_i32_0 = arith.constant 0 : i32
    return %arg0, %c0_i32 : i32, i32
  }
  func.func @transform_1(%arg0: i32) -> (i32, i32) {
    %c0_i32 = arith.constant 0 : i32
    %c0_i32_0 = arith.constant 0 : i32
    %c0_i32_1 = arith.constant 0 : i32
    return %c0_i32, %c0_i32_0 : i32, i32
  }
  func.func @transform_2(%arg0: i32) -> (i32, i32) {
    %c0_i32 = arith.constant 0 : i32
    %c0_i32_0 = arith.constant 0 : i32
    return %arg0, %c0_i32 : i32, i32
  }
}

</mosaic_0001>

<bundles_post_ra>
// kernel: tile.17
= control target key start
LH: loop header
LB: loop body
LE: loop exit
PB: predicated region body
PF: predicated region fallthrough
CT: control target
= control target key end

     0   :  { %s22_s0 = inlined_call_operand.vmem [shape: f32[32], index: 0, kind: input, shape index: {}]   ;;  %s23_s1 = inlined_call_operand.vmem [shape: f32[4,32], index: 1, kind: output, shape index: {}]  }
   0x1   :  { %v4_v0 = vld [vmem:[%s22_s0] ss:$0 sm:$0xff] }
   0x2   :  { %5 = vst [vmem:[%s23_s1] sm:$0xf] %v4_v0 }

// kernel: tile.19
= control target key start
LH: loop header
LB: loop body
LE: loop exit
PB: predicated region body
PF: predicated region fallthrough
CT: control target
= control target key end

     0   :  { %vm8_vm0 = vcmask 261120   ;;  %s40_s8 = smov 32   ;;  %s41_s9 = smov 64   ;;  %vm14_vm1 = vcmask 1048320   ;;  %vm20_vm2 = vcmask 785920   ;;  %vm26_vm3 = vcmask 523520   ;;  %s58_s0 = inlined_call_operand.vmem [shape: f32[4,32], index: 0, kind: input, shape index: {}]   ;;  %s59_s1 = inlined_call_operand.vmem [shape: f32[1,128], index: 1, kind: output, shape index: {}]  }
   0x1   :  { %v5_v0 = vld [vmem:[%s58_s0] sm:$0xf]  ;;  %s39_s0 = smov 96  }
   0x2   :  { %6 = vst [vmem:[#allocation1] sm:$0xf] %v5_v0 }
   0x9   :  { %v11_v1 = vld [vmem:[#allocation1 + $0x3] sm:$0x1]   ;;  %v23_v2 = vld [vmem:[#allocation1 + $0x1] sm:$0x1]   ;;  %v7_v3 = vld [vmem:[#allocation1] sm:$0x1]  }
   0xa   :  { %12 = vrot.lane.b32.xlu0 %v11_v1, %s39_s0  ;;  %24 = vrot.lane.b32.xlu1 %v23_v2, %s40_s8  ;;  %v17_v4 = vld [vmem:[#allocation1 + $0x2] sm:$0x1]   ;;  %9 = vst.msk [vmem:[#allocation0] sm:$0x1] %vm8_vm0, %v7_v3  }
   0xe   :  { %18 = vrot.lane.b32.xlu0 %v17_v4, %s41_s9 }
  0x7c   :  { %v13_v5 = vpop.permute.xlu0 %12   ;;  %v25_v6 = vpop.permute.xlu1 %24  }
  0x7d   :  { %15 = vst.msk [vmem:[#allocation0] sm:$0x1] %vm14_vm1, %v13_v5  }
  0x80   :  { %v19_v7 = vpop.permute.xlu0 %18  }
  0x81   :  { %21 = vst.msk [vmem:[#allocation0] sm:$0x1] %vm20_vm2, %v19_v7  }
  0x82   :  { %27 = vst.msk [vmem:[#allocation0] sm:$0x1] %vm26_vm3, %v25_v6  }
  0x89   :  { %v32_v8 = vld [vmem:[#allocation0] sm:$0x1] }
  0x8a   :  { %35 = vst [vmem:[%s59_s1] sm:$0x1] %v32_v8 }

// kernel: positional_encoder.1
= control target key start
LH: loop header
LB: loop body
LE: loop exit
PB: predicated region body
PF: predicated region fallthrough
CT: control target
= control target key end

     0   :  { %v182_v0 = vmov 0   ;;  %v183_v2 = vmov 2   ;;  %v184_v3 = vmov 1   ;;  %v185_v4 = vmov 3   ;;  %s237_s0 = inlined_call_operand.vmem [shape: f32[4,4], index: 0, kind: input, shape index: {}]   ;;  %s238_s1 = inlined_call_operand.vmem [shape: f32[2,128], index: 1, kind: input, shape index: {}]   ;;  %s239_s2 = inlined_call_operand.vmem [shape: f32[4,128], index: 2, kind: output, shape index: {}]  }
   0x1   :  { %173 = vset.pattern.permute.xlu0 %v182_v0  ;;  %v11_v1 = vld [vmem:[%s237_s0] sm:$0xf]  ;;  %175 = vset.pattern.permute.xlu1 %v183_v2  ;;  %v36_v5 = vlaneseq  ;;  %vm30_vm0 = vcmask 261120   ;;  %vm32_vm1 = vcmask 523264   ;;  %vm34_vm2 = vcmask 785408  }
   0x2   :  { %15 = vperm.xlu0 %173, %v11_v1   ;;  %23 = vperm.xlu1 %175, %v11_v1   ;;  %v12_v10 = vld [vmem:[%s238_s1] sm:$0x3]  ;;  %v186_v31 = vmov 683565275   ;;  %v187_v33 = vmov 2475754826  }
   0x3   :  { %v37_v6 = vshrl.u32 %v36_v5, 7  ;;  %v188_v36 = vmov 2131351028   ;;  %v189_v39 = vmov 2102212464  }
   0x4   :  { %v190_v42 = vmov 920167782   ;;  %v191_v45 = vmov 1326507024  }
   0x5   :  { %v38_v9 = vsub.s32 0, %v37_v6  ;;  %v43_v11 = vsub.s32 1, %v37_v6 }
   0x6   :  { %174 = vset.pattern.permute.xlu0 %v184_v3  ;;  %176 = vset.pattern.permute.xlu1 %v185_v4 }
   0x7   :  { %19 = vperm.xlu0 %174, %v11_v1   ;;  %27 = vperm.xlu1 %176, %v11_v1   ;;  %v39_v13 = vrot.slane %v12_v10, %v38_v9  ;;  %v44_v16 = vrot.slane %v12_v10, %v43_v11 }
   0xb   :  { %177 = vset.pattern.permute.xlu0 %v185_v4 }
  0x7d   :  { %v16_v7 = vpop.permute.xlu0 %15  ;;  %v24_v8 = vpop.permute.xlu1 %23 }
  0x82   :  { %v20_v12 = vpop.permute.xlu0 %19  ;;  %v28_v14 = vpop.permute.xlu1 %27 }
  0x83   :  { %v31_v15 = vsel %vm30_vm0, %v16_v7, %v20_v12 }
  0x84   :  { %v33_v17 = vsel %vm32_vm1, %v31_v15, %v24_v8 }
  0x85   :  { %v35_v18 = vsel %vm34_vm2, %v33_v17, %v28_v14 }
  0x86   :  { %v40_v19 = vmul.f32 %v39_v13, %v35_v18 }
  0x88   :  { %v213_v20 = vadd.f32 %v44_v16, %v40_v19 }
  0x8a   :  { %v49_v21 = vand.u32 2139095040, %v213_v20  ;;  %v46_v25 = vand.u32 2147483647, %v213_v20  ;;  %vm48_vm10 = vcmp.lt.s32.totalorder %v213_v20, 0  ;;  %vm138_vm15 = vweird.f32 %v213_v20 }
  0x8c   :  { %v50_v22 = vshrl.u32 %v49_v21, 23  ;;  %v53_v28 = vand.u32 8388607, %v46_v25  ;;  %vm47_vm11 = vcmp.le.f32.partialorder %v46_v25, 0.7853982 }
  0x8e   :  { %v155_v23 = vadd.s32 4294967169, %v50_v22  ;;  %v54_v47 = vor.u32 8388608, %v53_v28 }
  0x90   :  { %v56_v24 = vadd.s32 1, %v155_v23  ;;  %v94_v61 = vshll.u32 %v54_v47, 8 }
  0x92   :  { %vm57_vm3 = vcmp.gt.s32.totalorder %v56_v24, 0 }
  0x93   :  { %v58_v26 = vsel %vm57_vm3, %v56_v24, 0 }
  0x94   :  { %v60_v27 = vand.u32 31, %v58_v26  ;;  %v59_v30 = vshrl.u32 %v58_v26, 5 }
  0x96   :  { %v61_v29 = vsub.s32 32, %v60_v27  ;;  %v63_v32 = vshll.u32 %v186_v31, %v60_v27  ;;  %v66_v34 = vshll.u32 %v187_v33, %v60_v27  ;;  %v69_v38 = vshll.u32 %v188_v36, %v60_v27 }
  0x97   :  { %v72_v41 = vshll.u32 %v189_v39, %v60_v27  ;;  %v75_v44 = vshll.u32 %v190_v42, %v60_v27  ;;  %vm78_vm4 = vcmp.lt.s32.totalorder %v59_v30, 1  ;;  %vm81_vm5 = vcmp.lt.s32.totalorder %v59_v30, 4 }
  0x98   :  { %v64_v35 = vshrl.u32 %v187_v33, %v61_v29  ;;  %v67_v37 = vshrl.u32 %v188_v36, %v61_v29  ;;  %v70_v40 = vshrl.u32 %v189_v39, %v61_v29  ;;  %v73_v43 = vshrl.u32 %v190_v42, %v61_v29 }
  0x99   :  { %v76_v46 = vshrl.u32 %v191_v45, %v61_v29  ;;  %v62_v56 = vshrl.u32 %v186_v31, %v61_v29  ;;  %vm80_vm6 = vcmp.lt.s32.totalorder %v59_v30, 3  ;;  %vm79_vm7 = vcmp.lt.s32.totalorder %v59_v30, 2 }
  0x9a   :  { %v65_v48 = vor.u32 %v64_v35, %v63_v32  ;;  %v68_v49 = vor.u32 %v67_v37, %v66_v34  ;;  %v71_v50 = vor.u32 %v70_v40, %v69_v38  ;;  %v74_v51 = vor.u32 %v73_v43, %v72_v41 }
  0x9b   :  { %v77_v52 = vor.u32 %v76_v46, %v75_v44 }
  0x9c   :  { %v83_v53 = vsel %vm81_vm5, %v71_v50, 2102212464  ;;  %v86_v54 = vsel %vm78_vm4, %v65_v48, %v68_v49  ;;  %v90_v55 = vsel %vm78_vm4, %v68_v49, %v71_v50  ;;  %v87_v57 = vsel %vm81_vm5, %v74_v51, 920167782 }
  0x9d   :  { %v91_v58 = vsel %vm81_vm5, %v77_v52, 1326507024  ;;  %v88_v59 = vsel %vm80_vm6, %v71_v50, %v87_v57  ;;  %v82_v62 = vsel %vm78_vm4, %v62_v56, %v65_v48  ;;  %v84_v63 = vsel %vm80_vm6, %v68_v49, %v83_v53 }
  0x9e   :  { %v92_v60 = vsel %vm80_vm6, %v74_v51, %v91_v58  ;;  %v89_v0 = vsel %vm79_vm7, %v86_v54, %v88_v59  ;;  %v85_v6 = vsel %vm79_vm7, %v82_v62, %v84_v63 }
  0x9f   :  { %v93_v1 = vsel %vm79_vm7, %v90_v55, %v92_v60  ;;  %v222_v4 = vmul.u32.u64.low %v94_v61, %v89_v0  ;;  %v223_v5 = vmul.u32.u64.high %v94_v61, %v89_v0, %v222_v4  ;;  %v101_v8 = vmul.u32 %v94_v61, %v85_v6 }
  0xa0   :  { %v219_v2 = vmul.u32.u64.low %v94_v61, %v93_v1  ;;  %v220_v3 = vmul.u32.u64.high %v94_v61, %v93_v1, %v219_v2 }
  0xa1   :  { %v104_v7 = vadd.s32 1, %v223_v5 }
  0xa2   :  { %vm103_vm8 = vc.u32 %v220_v3, %v222_v4  ;;  %v102_v21 = vadd.s32 %v222_v4, %v220_v3 }
  0xa3   :  { %v105_v9 = vsel %vm103_vm8, %v104_v7, %v223_v5 }
  0xa4   :  { %v106_v10 = vadd.s32 %v105_v9, %v101_v8 }
  0xa6   :  { %v107_v11 = vadd.s32 536870912, %v106_v10 }
  0xa8   :  { %v108_v12 = vshrl.u32 %v107_v11, 30 }
  0xaa   :  { %v109_v13 = vshll.u32 %v108_v12, 30  ;;  %v132_v35 = vsub.s32 4, %v108_v12 }
  0xac   :  { %v110_v14 = vsub.s32 %v106_v10, %v109_v13  ;;  %v133_v38 = vsel %vm48_vm10, %v132_v35, %v108_v12 }
  0xad   :  { %v135_v39 = vsel %vm47_vm11, 0, %v133_v38 }
  0xae   :  { %v112_v15 = vsub.s32 0, %v110_v14  ;;  %v139_v40 = vadd.s32 3, %v135_v39 }
  0xb0   :  { %v156_v16 = vmin.u32 %v112_v15, %v110_v14  ;;  %v140_v41 = vand.u32 3, %v139_v40 }
  0xb2   :  { %v114_v17 = vclz %v156_v16  ;;  %vm145_vm12 = vcmp.eq.s32.totalorder %v140_v41, 2  ;;  %vm142_vm13 = vcmp.eq.s32.totalorder %v140_v41, 0  ;;  %vm141_vm14 = vcmp.lt.s32.totalorder %v140_v41, 2 }
  0xb4   :  { %v157_v18 = vadd.s32 4294967294, %v114_v17 }
  0xb6   :  { %vm158_vm9 = vcmp.lt.s32.totalorder %v157_v18, 0 }
  0xb7   :  { %v117_v19 = vsel %vm158_vm9, 0, %v157_v18 }
  0xb8   :  { %v118_v22 = vsub.s32 32, %v117_v19  ;;  %v122_v23 = vsub.s32 4294967266, %v117_v19  ;;  %v119_v24 = vshll.u32 %v110_v14, %v117_v19 }
  0xba   :  { %v120_v26 = vshrl.u32 %v102_v21, %v118_v22  ;;  %v123_v27 = vadd.s32 127, %v122_v23 }
  0xbc   :  { %v121_v28 = vor.u32 %v120_v26, %v119_v24  ;;  %v124_v29 = vshll.u32 %v123_v27, 23 }
  0xbe   :  { %v125_v30 = vor.u32 4788187, %v124_v29  ;;  %v128_v32 = vcvt.s32.f32 %v121_v28 }
  0xc0   :  { %v126_v31 = vand.u32 2147483647, %v125_v30 }
  0xc2   :  { %v129_v33 = vmul.f32 %v128_v32, %v126_v31 }
  0xc4   :  { %v130_v34 = vxor.u32 2147483648, %v129_v33 }
  0xc6   :  { %v131_v36 = vsel %vm48_vm10, %v130_v34, %v129_v33 }
  0xc7   :  { %v134_v37 = vsel %vm47_vm11, %v213_v20, %v131_v36 }
  0xc8   :  { %178 = vcosq.f32 %v134_v37 }
  0xc9   :  { %180 = vsinq.f32 %v134_v37 }
  0xd5   :  { %v179_v42 = vpop.eup %178 }
  0xd6   :  { %v181_v43 = vpop.eup %180  ;;  %v146_v44 = vxor.u32 2147483648, %v179_v42 }
  0xd7   :  { %v143_v45 = vxor.u32 2147483648, %v181_v43 }
  0xd8   :  { %v147_v46 = vsel %vm145_vm12, %v146_v44, %v181_v43 }
  0xd9   :  { %v144_v47 = vsel %vm142_vm13, %v179_v42, %v143_v45 }
  0xda   :  { %v148_v25 = vsel %vm141_vm14, %v144_v47, %v147_v46 }
  0xdb   :  { %v149_v48 = vsel %vm138_vm15, nan, %v148_v25 }
  0xdc   :  { %150 = vst [vmem:[%s239_s2] sm:$0xf] %v149_v48 }

</bundles_post_ra>
